<compile_context>
chip_gen: v6e
topology: v6e:2x2x1
jax: 0.10.0
libtpu: 0.0.40
codegen_flags: <defaults>
</compile_context>

<pallas_src>
import functools

import jax
import jax.numpy as jnp
from jax.experimental import pallas as pl
from jax.experimental.pallas import tpu as pltpu

LANE = 128
SUBLANE = 8


def _round_up(x, m):
    return (x + m - 1) // m * m


def _pad2(x, rows, cols):
    return jnp.pad(x, ((0, rows - x.shape[0]), (0, cols - x.shape[1])))


def value_kernel(s_ref,
                 w1_ref, b1_ref,   # Linear(s_dim -> hv_dim)
                 w2_ref, b2_ref,   # Linear(hv_dim -> hv_dim)
                 w3_ref, b3_ref,   # Linear(hv_dim -> 1)  (padded to 128 lanes)
                 v_ref):
    # s tile: [TB, S_pad] f32; weights: bf16 [in_pad, out_pad]; biases: f32 [1, out_pad]
    s = s_ref[...].astype(jnp.bfloat16)

    h1 = jnp.dot(s, w1_ref[...], preferred_element_type=jnp.float32) + b1_ref[...]
    h1 = jnp.maximum(h1, 0.0)

    h2 = jnp.dot(h1.astype(jnp.bfloat16), w2_ref[...],
                 preferred_element_type=jnp.float32) + b2_ref[...]
    h2 = jnp.maximum(h2, 0.0)

    v = jnp.dot(h2.astype(jnp.bfloat16), w3_ref[...],
                preferred_element_type=jnp.float32) + b3_ref[...]
    v_ref[...] = v.astype(v_ref.dtype)


@functools.partial(jax.jit, static_argnames=("block_b",))
def value_forward(s, params, block_b=128):
    """s: [B, s_dim] f32. params: (w1,b1,w2,b2,w3,b3), weights stored [in, out].
    Returns value: [B, 1] f32 (matches torch Value.forward)."""
    w1, b1, w2, b2, w3, b3 = params
    B, s_dim = s.shape
    h_dim = w1.shape[1]
    out_dim = w3.shape[1]  # == 1

    # lane-pad every feature dim to a multiple of 128; pad batch to a multiple of TB
    S_pad = _round_up(s_dim, LANE)
    H_pad = _round_up(h_dim, LANE)
    O_pad = _round_up(out_dim, LANE)
    TB = min(block_b, _round_up(B, SUBLANE))
    B_pad = _round_up(B, TB)

    s_p = _pad2(s, B_pad, S_pad)
    w1_p = _pad2(w1, S_pad, H_pad).astype(jnp.bfloat16)
    w2_p = _pad2(w2, H_pad, H_pad).astype(jnp.bfloat16)
    w3_p = _pad2(w3, H_pad, O_pad).astype(jnp.bfloat16)
    b1_p = _pad2(b1, 1, H_pad)
    b2_p = _pad2(b2, 1, H_pad)
    b3_p = _pad2(b3, 1, O_pad)

    resident = lambda shape: pl.BlockSpec(shape, lambda i: (0, 0))  # stays in VMEM

    v_pad = pl.pallas_call(
        value_kernel,
        out_shape=jax.ShapeDtypeStruct((B_pad, O_pad), jnp.float32),
        grid=(B_pad // TB,),
        in_specs=[
            pl.BlockSpec((TB, S_pad), lambda i: (i, 0)),   # batch-tiled input
            resident((S_pad, H_pad)), resident((1, H_pad)),
            resident((H_pad, H_pad)), resident((1, H_pad)),
            resident((H_pad, O_pad)), resident((1, O_pad)),
        ],
        out_specs=pl.BlockSpec((TB, O_pad), lambda i: (i, 0)),
        compiler_params=pltpu.CompilerParams(
            dimension_semantics=("parallel",)),
    )(s_p, w1_p, b1_p, w2_p, b2_p, w3_p, b3_p)

    return v_pad[:B, :out_dim]


def init_params(key, s_dim, hv_dim):
    """Deterministic synthetic params. Weights are [in, out] (transposed vs torch)."""
    dims = [(s_dim, hv_dim), (hv_dim, hv_dim), (hv_dim, 1)]
    params = []
    for i, (din, dout) in enumerate(dims):
        kw, kb = jax.random.split(jax.random.fold_in(key, i))
        bound = 1.0 / (din ** 0.5)  # mimic PyTorch default uniform init range
        w = jax.random.uniform(kw, (din, dout), jnp.float32, -bound, bound)
        b = jax.random.uniform(kb, (1, dout), jnp.float32, -bound, bound)
        params += [w, b]
    return tuple(params)


def value_ref_f32(s, params):
    w1, b1, w2, b2, w3, b3 = params
    h1 = jnp.maximum(s @ w1 + b1, 0.0)
    h2 = jnp.maximum(h1 @ w2 + b2, 0.0)
    return h2 @ w3 + b3


def value_ref_bf16(s, params):
    """Same precision recipe as the kernel (bf16 operands, f32 accumulation)."""
    w1, b1, w2, b2, w3, b3 = params
    bf = jnp.bfloat16
    h1 = jnp.maximum(jnp.dot(s.astype(bf), w1.astype(bf),
                             preferred_element_type=jnp.float32) + b1, 0.0)
    h2 = jnp.maximum(jnp.dot(h1.astype(bf), w2.astype(bf),
                             preferred_element_type=jnp.float32) + b2, 0.0)
    return jnp.dot(h2.astype(bf), w3.astype(bf),
                   preferred_element_type=jnp.float32) + b3


if __name__ == "__main__":
    key = jax.random.PRNGKey(0)
    B, s_dim, hv_dim = 8, 32, 32

    params = init_params(key, s_dim, hv_dim)
    s = jax.random.normal(jax.random.fold_in(key, 100), (B, s_dim), jnp.float32)

    value = value_forward(s, params)
    jax.block_until_ready(value)

    assert value.shape == (B, 1)
    # tight check vs a reference using the same bf16-operand / f32-accum recipe
    assert jnp.allclose(value, value_ref_bf16(s, params), atol=1e-4, rtol=1e-4)
    # loose check vs full-f32 reference (bf16 operands lose mantissa bits)
    assert jnp.allclose(value, value_ref_f32(s, params), atol=5e-2, rtol=5e-2)

    print("KERNEL_OK")
</pallas_src>

<mosaic_0001>
module attributes {stable_mosaic.version = 11 : i64} {
  func.func @value_kernel(%arg0: i32, %arg1: memref<8x128xf32, #tpu.memory_space<vmem>>, %arg2: memref<128x128xbf16, #tpu.memory_space<vmem>>, %arg3: memref<1x128xf32, #tpu.memory_space<vmem>>, %arg4: memref<128x128xbf16, #tpu.memory_space<vmem>>, %arg5: memref<1x128xf32, #tpu.memory_space<vmem>>, %arg6: memref<128x128xbf16, #tpu.memory_space<vmem>>, %arg7: memref<1x128xf32, #tpu.memory_space<vmem>>, %arg8: memref<8x128xf32, #tpu.memory_space<vmem>>) attributes {dimension_semantics = [#tpu.dimension_semantics<parallel>], iteration_bounds = array<i64: 1>, scalar_prefetch = 0 : i64, scratch_operands = 0 : i64, tpu.core_type = #tpu.core_type<tc>, window_params = [{transform_indices = @transform_0, window_bounds = array<i64: 8, 128>}, {pipeline_mode = #tpu.pipeline_mode<synchronous>, transform_indices = @transform_1, window_bounds = array<i64: 128, 128>}, {pipeline_mode = #tpu.pipeline_mode<synchronous>, transform_indices = @transform_2, window_bounds = array<i64: 1, 128>}, {pipeline_mode = #tpu.pipeline_mode<synchronous>, transform_indices = @transform_3, window_bounds = array<i64: 128, 128>}, {pipeline_mode = #tpu.pipeline_mode<synchronous>, transform_indices = @transform_4, window_bounds = array<i64: 1, 128>}, {pipeline_mode = #tpu.pipeline_mode<synchronous>, transform_indices = @transform_5, window_bounds = array<i64: 128, 128>}, {pipeline_mode = #tpu.pipeline_mode<synchronous>, transform_indices = @transform_6, window_bounds = array<i64: 1, 128>}, {transform_indices = @transform_7, window_bounds = array<i64: 8, 128>}]} {
    %c0 = arith.constant 0 : index
    %c0_0 = arith.constant 0 : index
    %0 = vector.load %arg1[%c0, %c0_0] : memref<8x128xf32, #tpu.memory_space<vmem>>, vector<8x128xf32>
    %1 = arith.truncf %0 : vector<8x128xf32> to vector<8x128xbf16>
    %c0_1 = arith.constant 0 : index
    %c0_2 = arith.constant 0 : index
    %2 = vector.load %arg2[%c0_1, %c0_2] : memref<128x128xbf16, #tpu.memory_space<vmem>>, vector<128x128xbf16>
    %cst = arith.constant dense<0.000000e+00> : vector<8x128xf32>
    %3 = tpu.matmul %1, %2, %cst {dimension_numbers = #tpu.dot_dimension_numbers<[1], [0], [0], [1], [0, 0, 1, 1], [], []>} : vector<8x128xbf16>, vector<128x128xbf16>, vector<8x128xf32> -> vector<8x128xf32>
    %c0_3 = arith.constant 0 : index
    %c0_4 = arith.constant 0 : index
    %4 = vector.load %arg3[%c0_3, %c0_4] : memref<1x128xf32, #tpu.memory_space<vmem>>, vector<1x128xf32>
    %5 = vector.broadcast %4 : vector<1x128xf32> to vector<8x128xf32>
    %6 = arith.addf %3, %5 : vector<8x128xf32>
    %cst_5 = arith.constant 0.000000e+00 : f32
    %7 = vector.broadcast %cst_5 : f32 to vector<8x128xf32>
    %8 = arith.maximumf %6, %7 : vector<8x128xf32>
    %9 = arith.truncf %8 : vector<8x128xf32> to vector<8x128xbf16>
    %c0_6 = arith.constant 0 : index
    %c0_7 = arith.constant 0 : index
    %10 = vector.load %arg4[%c0_6, %c0_7] : memref<128x128xbf16, #tpu.memory_space<vmem>>, vector<128x128xbf16>
    %cst_8 = arith.constant dense<0.000000e+00> : vector<8x128xf32>
    %11 = tpu.matmul %9, %10, %cst_8 {dimension_numbers = #tpu.dot_dimension_numbers<[1], [0], [0], [1], [0, 0, 1, 1], [], []>} : vector<8x128xbf16>, vector<128x128xbf16>, vector<8x128xf32> -> vector<8x128xf32>
    %c0_9 = arith.constant 0 : index
    %c0_10 = arith.constant 0 : index
    %12 = vector.load %arg5[%c0_9, %c0_10] : memref<1x128xf32, #tpu.memory_space<vmem>>, vector<1x128xf32>
    %13 = vector.broadcast %12 : vector<1x128xf32> to vector<8x128xf32>
    %14 = arith.addf %11, %13 : vector<8x128xf32>
    %cst_11 = arith.constant 0.000000e+00 : f32
    %15 = vector.broadcast %cst_11 : f32 to vector<8x128xf32>
    %16 = arith.maximumf %14, %15 : vector<8x128xf32>
    %17 = arith.truncf %16 : vector<8x128xf32> to vector<8x128xbf16>
    %c0_12 = arith.constant 0 : index
    %c0_13 = arith.constant 0 : index
    %18 = vector.load %arg6[%c0_12, %c0_13] : memref<128x128xbf16, #tpu.memory_space<vmem>>, vector<128x128xbf16>
    %cst_14 = arith.constant dense<0.000000e+00> : vector<8x128xf32>
    %19 = tpu.matmul %17, %18, %cst_14 {dimension_numbers = #tpu.dot_dimension_numbers<[1], [0], [0], [1], [0, 0, 1, 1], [], []>} : vector<8x128xbf16>, vector<128x128xbf16>, vector<8x128xf32> -> vector<8x128xf32>
    %c0_15 = arith.constant 0 : index
    %c0_16 = arith.constant 0 : index
    %20 = vector.load %arg7[%c0_15, %c0_16] : memref<1x128xf32, #tpu.memory_space<vmem>>, vector<1x128xf32>
    %21 = vector.broadcast %20 : vector<1x128xf32> to vector<8x128xf32>
    %22 = arith.addf %19, %21 : vector<8x128xf32>
    %c0_17 = arith.constant 0 : index
    %c0_18 = arith.constant 0 : index
    %23 = vector.load %arg8[%c0_17, %c0_18] : memref<8x128xf32, #tpu.memory_space<vmem>>, vector<8x128xf32>
    tpu.vector_store %arg8[%c0_17, %c0_18], %22 {strides = array<i32>} : memref<8x128xf32, #tpu.memory_space<vmem>>, vector<8x128xf32>,
    return
  }
  func.func @transform_0(%arg0: i32) -> (i32, i32) {
    %c0_i32 = arith.constant 0 : i32
    %c0_i32_0 = arith.constant 0 : i32
    return %arg0, %c0_i32 : i32, i32
  }
  func.func @transform_1(%arg0: i32) -> (i32, i32) {
    %c0_i32 = arith.constant 0 : i32
    %c0_i32_0 = arith.constant 0 : i32
    %c0_i32_1 = arith.constant 0 : i32
    return %c0_i32, %c0_i32_0 : i32, i32
  }
  func.func @transform_2(%arg0: i32) -> (i32, i32) {
    %c0_i32 = arith.constant 0 : i32
    %c0_i32_0 = arith.constant 0 : i32
    %c0_i32_1 = arith.constant 0 : i32
    return %c0_i32, %c0_i32_0 : i32, i32
  }
  func.func @transform_3(%arg0: i32) -> (i32, i32) {
    %c0_i32 = arith.constant 0 : i32
    %c0_i32_0 = arith.constant 0 : i32
    %c0_i32_1 = arith.constant 0 : i32
    return %c0_i32, %c0_i32_0 : i32, i32
  }
  func.func @transform_4(%arg0: i32) -> (i32, i32) {
    %c0_i32 = arith.constant 0 : i32
    %c0_i32_0 = arith.constant 0 : i32
    %c0_i32_1 = arith.constant 0 : i32
    return %c0_i32, %c0_i32_0 : i32, i32
  }
  func.func @transform_5(%arg0: i32) -> (i32, i32) {
    %c0_i32 = arith.constant 0 : i32
    %c0_i32_0 = arith.constant 0 : i32
    %c0_i32_1 = arith.constant 0 : i32
    return %c0_i32, %c0_i32_0 : i32, i32
  }
  func.func @transform_6(%arg0: i32) -> (i32, i32) {
    %c0_i32 = arith.constant 0 : i32
    %c0_i32_0 = arith.constant 0 : i32
    %c0_i32_1 = arith.constant 0 : i32
    return %c0_i32, %c0_i32_0 : i32, i32
  }
  func.func @transform_7(%arg0: i32) -> (i32, i32) {
    %c0_i32 = arith.constant 0 : i32
    %c0_i32_0 = arith.constant 0 : i32
    return %arg0, %c0_i32 : i32, i32
  }
}

</mosaic_0001>

<bundles_post_ra>
// kernel: value_forward.1
= control target key start
LH: loop header
LB: loop body
LE: loop exit
PB: predicated region body
PF: predicated region fallthrough
CT: control target
= control target key end

     0   :  { %v511_v0 = vmov 0.0   ;;  %vm512_vm0 = vmmov 0   ;;  %s670_s1 = inlined_call_operand.vmem [shape: bf16[128,128], index: 1, kind: input, shape index: {}]   ;;  %s671_s3 = inlined_call_operand.vmem [shape: bf16[128,128], index: 3, kind: input, shape index: {}]   ;;  %s672_s0 = inlined_call_operand.vmem [shape: f32[8,128], index: 0, kind: input, shape index: {}]   ;;  %s673_s5 = inlined_call_operand.vmem [shape: bf16[128,128], index: 5, kind: input, shape index: {}]   ;;  %s674_s2 = inlined_call_operand.vmem [shape: f32[1,128], index: 2, kind: input, shape index: {}]   ;;  %s675_s4 = inlined_call_operand.vmem [shape: f32[1,128], index: 4, kind: input, shape index: {}]   ;;  %s676_s6 = inlined_call_operand.vmem [shape: f32[1,128], index: 6, kind: input, shape index: {}]   ;;  %s677_s7 = inlined_call_operand.vmem [shape: f32[8,128], index: 7, kind: output, shape index: {}]  }
   0x1   :  { %425 = vmatprep.subr.bf16.mxu0 %v511_v0  ;;  %v487_v1 = vld [vmem:[%s670_s1 + $0x38] sm:$0xff]   ;;  %441 = vmatprep.mubr.msk.bf16.mxu0 %vm512_vm0, %v511_v0  ;;  %v488_v2 = vld [vmem:[%s670_s1 + $0x30] sm:$0xff]   ;;  %v489_v3 = vld [vmem:[%s670_s1 + $0x28] sm:$0xff]  }
   0x2   :  { %445 = vmatprep.subr.bf16.mxu1 %v511_v0  ;;  %461 = vmatprep.mubr.msk.bf16.mxu1 %vm512_vm0, %v511_v0  ;;  %v495_v4 = vld [vmem:[%s671_s3 + $0x38] sm:$0xff]   ;;  %v490_v5 = vld [vmem:[%s670_s1 + $0x20] sm:$0xff]   ;;  %v496_v6 = vld [vmem:[%s671_s3 + $0x30] sm:$0xff]  }
   0x3   :  { %426 = vmatpush3.bf16.msra.mxu0 %v487_v1  ;;  %446 = vmatpush3.bf16.msra.mxu1 %v495_v4  ;;  %v491_v7 = vld [vmem:[%s670_s1 + $0x18] sm:$0xff]   ;;  %v497_v8 = vld [vmem:[%s671_s3 + $0x28] sm:$0xff]   ;;  %v492_v9 = vld [vmem:[%s670_s1 + $0x10] sm:$0xff]  }
   0x4   :  { %427 = vmatprep.subr.bf16.mxu0 %v511_v0  ;;  %447 = vmatprep.subr.bf16.mxu1 %v511_v0  ;;  %v498_v10 = vld [vmem:[%s671_s3 + $0x20] sm:$0xff]   ;;  %v493_v11 = vld [vmem:[%s670_s1 + $0x8] sm:$0xff]   ;;  %v499_v12 = vld [vmem:[%s671_s3 + $0x18] sm:$0xff]  }
   0x5   :  { %v494_v13 = vld [vmem:[%s670_s1] sm:$0xff]   ;;  %v500_v15 = vld [vmem:[%s671_s3 + $0x10] sm:$0xff]   ;;  %v501_v17 = vld [vmem:[%s671_s3 + $0x8] sm:$0xff]  }
   0x6   :  { %v27_v14 = vld [vmem:[%s672_s0] sm:$0xff]  ;;  %v503_v19 = vld [vmem:[%s673_s5 + $0x38] sm:$0xff]   ;;  %v504_v20 = vld [vmem:[%s673_s5 + $0x30] sm:$0xff]  }
   0x7   :  { %428 = vmatpush3.bf16.msra.mxu0 %v488_v2  ;;  %448 = vmatpush3.bf16.msra.mxu1 %v496_v6  ;;  %v28_v16 = vpack.c.bf16 %v27_v14, %v27_v14  ;;  %v502_v18 = vld [vmem:[%s671_s3] sm:$0xff]   ;;  %v505_v21 = vld [vmem:[%s673_s5 + $0x28] sm:$0xff]   ;;  %v507_v23 = vld [vmem:[%s673_s5 + $0x18] sm:$0xff]  }
   0x8   :  { %429 = vmatprep.subr.bf16.mxu0 %v511_v0  ;;  %449 = vmatprep.subr.bf16.mxu1 %v511_v0  ;;  %v506_v22 = vld [vmem:[%s673_s5 + $0x20] sm:$0xff]   ;;  %v508_v24 = vld [vmem:[%s673_s5 + $0x10] sm:$0xff]   ;;  %v509_v33 = vld [vmem:[%s673_s5 + $0x8] sm:$0xff]  }
   0x9   :  { %v371_v25 = vld [vmem:[%s674_s2] ss:$0 sm:$0xff] }
   0xa   :  { %v510_v34 = vld [vmem:[%s673_s5] sm:$0xff]  }
   0xb   :  { %430 = vmatpush3.bf16.msra.mxu0 %v489_v3  ;;  %450 = vmatpush3.bf16.msra.mxu1 %v497_v8  ;;  %v380_v35 = vld [vmem:[%s675_s4] ss:$0 sm:$0xff] }
   0xc   :  { %431 = vmatprep.subr.bf16.mxu0 %v511_v0  ;;  %451 = vmatprep.subr.bf16.mxu1 %v511_v0  ;;  %v389_v43 = vld [vmem:[%s676_s6] ss:$0 sm:$0xff] }
   0xf   :  { %432 = vmatpush3.bf16.msra.mxu0 %v490_v5  ;;  %452 = vmatpush3.bf16.msra.mxu1 %v498_v10 }
  0x10   :  { %433 = vmatprep.subr.bf16.mxu0 %v511_v0  ;;  %453 = vmatprep.subr.bf16.mxu1 %v511_v0 }
  0x13   :  { %434 = vmatpush3.bf16.msra.mxu0 %v491_v7  ;;  %454 = vmatpush3.bf16.msra.mxu1 %v499_v12 }
  0x14   :  { %435 = vmatprep.subr.bf16.mxu0 %v511_v0  ;;  %455 = vmatprep.subr.bf16.mxu1 %v511_v0 }
  0x17   :  { %436 = vmatpush3.bf16.msra.mxu0 %v492_v9  ;;  %456 = vmatpush3.bf16.msra.mxu1 %v500_v15 }
  0x18   :  { %437 = vmatprep.subr.bf16.mxu0 %v511_v0  ;;  %457 = vmatprep.subr.bf16.mxu1 %v511_v0 }
  0x1b   :  { %438 = vmatpush3.bf16.msra.mxu0 %v493_v11  ;;  %458 = vmatpush3.bf16.msra.mxu1 %v501_v17 }
  0x1c   :  { %439 = vmatprep.subr.bf16.mxu0 %v511_v0  ;;  %459 = vmatprep.subr.bf16.mxu1 %v511_v0 }
  0x1f   :  { %440 = vmatpush3.bf16.msra.mxu0 %v494_v13  ;;  %460 = vmatpush3.bf16.msra.mxu1 %v502_v18 }
  0x20   :  { %465 = vmatprep.subr.bf16.mxu0 %v511_v0 }
  0x22   :  { %442 = vmatmul.mubr.bf16.vlgmr.msra.gmra.mxu0 %v28_v16 }
  0x23   :  { %481 = vmatprep.mubr.msk.bf16.mxu0 %vm512_vm0, %v511_v0  ;;  %466 = vmatpush3.bf16.msra.mxu0 %v503_v19 }
  0x24   :  { %467 = vmatprep.subr.bf16.mxu0 %v511_v0 }
  0x27   :  { %468 = vmatpush3.bf16.msra.mxu0 %v504_v20 }
  0x28   :  { %469 = vmatprep.subr.bf16.mxu0 %v511_v0 }
  0x2b   :  { %470 = vmatpush3.bf16.msra.mxu0 %v505_v21 }
  0x2c   :  { %471 = vmatprep.subr.bf16.mxu0 %v511_v0 }
  0x2f   :  { %472 = vmatpush3.bf16.msra.mxu0 %v506_v22 }
  0x30   :  { %473 = vmatprep.subr.bf16.mxu0 %v511_v0 }
  0x33   :  { %474 = vmatpush3.bf16.msra.mxu0 %v507_v23 }
  0x34   :  { %475 = vmatprep.subr.bf16.mxu0 %v511_v0 }
  0x37   :  { %476 = vmatpush3.bf16.msra.mxu0 %v508_v24 }
  0x38   :  { %477 = vmatprep.subr.bf16.mxu0 %v511_v0 }
  0x3b   :  { %478 = vmatpush3.bf16.msra.mxu0 %v509_v33 }
  0x3c   :  { %479 = vmatprep.subr.bf16.mxu0 %v511_v0 }
  0x3f   :  { %480 = vmatpush3.bf16.msra.mxu0 %v510_v34 }
  0xe2   :  { %v134_v26 = vpop.f32.mrf.mxu0 }
  0xe3   :  { %v135_v27 = vadd.f32 %v371_v25, %v134_v26 }
  0xe4   :  { %v443_v28 = vpop.f32.mrf.mxu0 }
  0xe5   :  { %v140_v29 = vmax.f32 %v135_v27, 0.0 }
  0xe6   :  { %v137_v30 = vpop.f32.mrf.mxu0 }
  0xe7   :  { %v141_v31 = vpack.c.bf16 %v140_v29, %v140_v29 }
  0xe8   :  { %v444_v32 = vpop.f32.mrf.mxu0 }
  0xe9   :  { %462 = vmatmul.mubr.bf16.vlgmr.msra.gmra.mxu1 %v141_v31 }
 0x1a9   :  { %v247_v36 = vpop.f32.mrf.mxu1 }
 0x1aa   :  { %v248_v37 = vadd.f32 %v380_v35, %v247_v36 }
 0x1ab   :  { %v463_v38 = vpop.f32.mrf.mxu1 }
 0x1ac   :  { %v253_v39 = vmax.f32 %v248_v37, 0.0 }
 0x1ad   :  { %v250_v40 = vpop.f32.mrf.mxu1 }
 0x1ae   :  { %v254_v41 = vpack.c.bf16 %v253_v39, %v253_v39 }
 0x1af   :  { %v464_v42 = vpop.f32.mrf.mxu1 }
 0x1b0   :  { %482 = vmatmul.mubr.bf16.vlgmr.msra.gmra.mxu0 %v254_v41 }
 0x270   :  { %v360_v44 = vpop.f32.mrf.mxu0 }
 0x271   :  { %v361_v45 = vadd.f32 %v389_v43, %v360_v44 }
 0x272   :  { %v483_v46 = vpop.f32.mrf.mxu0 }
 0x273   :  { %366 = vst [vmem:[%s677_s7] sm:$0xff] %v361_v45 }
 0x274   :  { %v363_v47 = vpop.f32.mrf.mxu0 }
 0x276   :  { %v484_v48 = vpop.f32.mrf.mxu0 }

</bundles_post_ra>
